<compile_context>
chip_gen: v6e
topology: v6e:2x2x1
jax: 0.10.0
libtpu: 0.0.40
codegen_flags: <defaults>
</compile_context>

<pallas_src>
import functools
import math

import jax
import jax.numpy as jnp
from jax.experimental import pallas as pl
from jax.experimental.pallas import tpu as pltpu


# ----------------------------------------------------------------------------
# Kernels
# ----------------------------------------------------------------------------
def _kernel_bias(x_ref, w_ref, b_ref, o_ref, *, precision):
    # x_ref: (tm, Kg)  w_ref: (1, Kg, tn)  b_ref: (1, 1, tn)  o_ref: (tm, tn)
    acc = jnp.dot(x_ref[...], w_ref[0],
                  preferred_element_type=jnp.float32, precision=precision)
    o_ref[...] = (acc + b_ref[0].astype(jnp.float32)).astype(o_ref.dtype)


def _kernel_nobias(x_ref, w_ref, o_ref, *, precision):
    acc = jnp.dot(x_ref[...], w_ref[0],
                  preferred_element_type=jnp.float32, precision=precision)
    o_ref[...] = acc.astype(o_ref.dtype)


# ----------------------------------------------------------------------------
# Hardware / tiling helpers
# ----------------------------------------------------------------------------
def _vmem_capacity_bytes():
    """Physical VMEM per TensorCore (128 MiB v5e/v6e, 64 MiB v7x)."""
    try:
        info = pltpu.get_tpu_info()
        for name in ("vmem_capacity_bytes", "vmem_size_bytes"):
            cap = getattr(info, name, None)
            if cap:
                return int(cap)
    except Exception:
        pass
    return 64 * 1024 * 1024  # conservative fallback: v7x per-TC VMEM


def _choose_head_group(H, d_in, d_out, mxu_target=256):
    """Smallest head-group size hg (divisor of H) whose packed widths
    (hg*d_in, hg*d_out) are lane-aligned (128), preferring widths that reach
    the 256-wide MXU. Falls back to hg=H (full dense block-diagonal, legal
    because the block then equals the full feature extent)."""
    if d_in % 128 == 0 and d_out % 128 == 0:
        return 1  # per-head contraction: zero wasted MXU FLOPs
    lane_ok = None
    for g in range(1, H + 1):
        if H % g:
            continue
        if (g * d_in) % 128 or (g * d_out) % 128:
            continue
        if lane_ok is None:
            lane_ok = g
        if g * d_in >= mxu_target and g * d_out >= mxu_target:
            return g
    return lane_ok if lane_ok is not None else H


def pack_headwise_params(weight, mxu_target=256):
    """Pack the (H, d_out, d_in) head-wise weight ONCE (call at init, NOT per
    forward) into per-head-group block-diagonal tiles (G, hg*d_in, hg*d_out).
    The kernel then does a single MXU matmul per group with at most hg-fold
    (not H-fold) zero-block waste."""
    H, d_out, d_in = weight.shape
    hg = _choose_head_group(H, d_in, d_out, mxu_target)
    G = H // hg
    Kg, Ng = hg * d_in, hg * d_out
    w_t = jnp.swapaxes(weight, 1, 2)                    # (H, d_in, d_out)
    if hg == 1:
        w_pack = w_t                                    # (G, d_in, d_out)
    else:
        w_t = w_t.reshape(G, hg, d_in, d_out)
        eye = jnp.eye(hg, dtype=w_t.dtype)
        # w_pack[g, a*d_in + i, b*d_out + o] = weight[g*hg + a, o, i] * delta_ab
        w_pack = jnp.einsum("gaio,ab->gaibo", w_t, eye).reshape(G, Kg, Ng)
    meta = dict(H=H, d_in=d_in, d_out=d_out, hg=hg, G=G, Kg=Kg, Ng=Ng)
    return w_pack, meta


def _choose_tiles(M, Kg, Ng, x_isize, w_isize, budget):
    """Pick (tm, tn). tn splits the group's output width if the resident
    weight block would eat more than half the VMEM budget; tm fills the rest,
    rounded to whole 256-row MXU passes (or the dtype sublane tile). All
    buffers are conservatively counted as double-buffered."""
    def w_bytes(t):
        return 2 * Kg * t * w_isize

    tn = Ng
    if w_bytes(tn) > budget // 2 and Ng % 128 == 0:
        q = Ng // 128
        for d in sorted((d for d in range(1, q + 1) if q % d == 0), reverse=True):
            if w_bytes(128 * d) <= budget // 2:
                tn = 128 * d
                break
        else:
            tn = 128

    resident = w_bytes(tn) + 2 * tn * 4            # weight + bias row (f32 bound)
    avail = budget - resident
    per_row = 2 * (Kg + tn) * x_isize              # double-buffered x row + out row
    sub = max(8, 32 // max(1, x_isize))            # 8 (f32) / 16 (bf16) / 32 (int8)
    if avail < per_row * sub:
        # TODO(synk): add a K-axis (d_in) accumulation grid for head dims so
        # large that even a 128-wide weight chunk does not fit VMEM.
        raise ValueError(
            "LinearHeadwiseExpand: packed weight block does not fit in VMEM "
            f"(Kg={Kg}, tn={tn}, budget={budget} bytes).")

    tm = min(avail // per_row, 4096)
    if tm >= 256:
        tm = (tm // 256) * 256                     # whole 256-row MXU passes
    else:
        tm = max(sub, (tm // sub) * sub)
    if M <= tm:
        tm = M                                     # full extent is always legal
    return int(tm), int(tn)


def _maybe_single_buffered_spec(block_shape, index_map, single):
    """BlockSpec requesting single buffering for large, rarely-changing
    operands (the resident weight) so VMEM is not spent double-buffering."""
    if single:
        try:
            return pl.BlockSpec(block_shape, index_map,
                                pipeline_mode=pl.Buffered(1))
        except Exception:
            pass  # older jax without pipeline_mode: default double buffering
    return pl.BlockSpec(block_shape, index_map)


# ----------------------------------------------------------------------------
# Forward pass
# ----------------------------------------------------------------------------
def linear_headwise_expand_packed(x, w_pack, meta, bias=None, *, precision=None):
    """Forward. `(w_pack, meta)` come from pack_headwise_params (hoisted, so
    repacking never runs in the per-step path).

    Notes: at default matmul precision the MXU truncates f32 operands to bf16
    (same as jnp.einsum's default); pass precision=jax.lax.Precision.HIGHEST
    for fp32-faithful output. For bandwidth-bound deployments (esp. v5e) feed
    x / w_pack as bf16 — accumulation stays f32 inside the kernel."""
    B, S, F_in = x.shape
    G, Kg, Ng = meta["G"], meta["Kg"], meta["Ng"]
    if F_in != G * Kg:
        raise ValueError(f"x feature dim {F_in} != packed in_features {G * Kg}")
    F_out = G * Ng
    if bias is not None and bias.shape[0] != F_out:
        raise ValueError("bias length mismatch")
    M = B * S
    x2d = x.reshape(M, F_in)                       # free reshape, no transpose
    x_isize = jnp.dtype(x.dtype).itemsize
    w_isize = jnp.dtype(w_pack.dtype).itemsize

    # Per-generation VMEM sizing (per TensorCore, so v7x megacore is safe).
    cap = _vmem_capacity_bytes()
    vmem_limit = (cap * 3) // 4                    # ~96 MiB v5e/v6e, ~48 MiB v7x
    budget = max(vmem_limit - (4 << 20), 8 << 20)  # headroom for compiler scratch

    tm, tn = _choose_tiles(M, Kg, Ng, x_isize, w_isize, budget)
    NC = Ng // tn
    MT = pl.cdiv(M, tm)
    grid = (G, NC, MT)   # token axis innermost -> weight fetched once per (g, n)

    x_spec = pl.BlockSpec((tm, Kg), lambda g, n, m: (m, g))
    w_spec = _maybe_single_buffered_spec(
        (1, Kg, tn), lambda g, n, m: (g, 0, n),
        single=(Kg * tn * w_isize) >= (1 << 20))
    o_spec = pl.BlockSpec((tm, tn), lambda g, n, m: (m, g * NC + n))

    bias_bytes = 0 if bias is None else F_out * jnp.dtype(bias.dtype).itemsize
    common = dict(
        out_shape=jax.ShapeDtypeStruct((M, F_out), x.dtype),
        compiler_params=pltpu.CompilerParams(
            dimension_semantics=("parallel", "parallel", "parallel"),
            vmem_limit_bytes=int(vmem_limit)),
        cost_estimate=pl.CostEstimate(
            flops=int(2 * M * G * Kg * Ng),        # FLOPs actually executed
            transcendentals=0,
            bytes_accessed=int((M * F_in * NC + M * F_out) * x_isize
                               + G * Kg * Ng * w_isize + bias_bytes)),
    )

    if bias is not None:
        b3d = bias.reshape(G * NC, 1, tn)
        b_spec = pl.BlockSpec((1, 1, tn), lambda g, n, m: (g * NC + n, 0, 0))
        out2d = pl.pallas_call(
            functools.partial(_kernel_bias, precision=precision),
            grid_spec=pltpu.PrefetchScalarGridSpec(
                num_scalar_prefetch=0, grid=grid,
                in_specs=[x_spec, w_spec, b_spec], out_specs=o_spec),
            **common,
        )(x2d, w_pack, b3d)
    else:
        out2d = pl.pallas_call(
            functools.partial(_kernel_nobias, precision=precision),
            grid_spec=pltpu.PrefetchScalarGridSpec(
                num_scalar_prefetch=0, grid=grid,
                in_specs=[x_spec, w_spec], out_specs=o_spec),
            **common,
        )(x2d, w_pack)

    return out2d.reshape(B, S, F_out)


def linear_headwise_expand(x, weight, bias=None, *, precision=None):
    """Drop-in convenience (packs per call). For repeated use, call
    pack_headwise_params once and use linear_headwise_expand_packed."""
    w_pack, meta = pack_headwise_params(weight)
    return linear_headwise_expand_packed(x, w_pack, meta, bias, precision=precision)


def init_params(key, in_features, num_heads, out_features=None, use_bias=True,
                dtype=jnp.float32):
    """small_init_init_: normal with std=sqrt(2/(5*d_in)); bias zeros."""
    if out_features is None:
        out_features = in_features
    d_in = in_features // num_heads
    d_out = out_features // num_heads
    std = math.sqrt(2.0 / (5.0 * d_in))
    weight = std * jax.random.normal(key, (num_heads, d_out, d_in), dtype=dtype)
    bias = jnp.zeros((out_features,), dtype=dtype) if use_bias else None
    return weight, bias


if __name__ == "__main__":
    # Small config: in_features=32, num_heads=4 -> d_in=d_out=8, out_features=32
    B, S, in_features, num_heads = 2, 8, 32, 4

    key = jax.random.PRNGKey(0)
    kx, kw = jax.random.split(key)
    x = jax.random.normal(kx, (B, S, in_features), dtype=jnp.float32)
    weight, bias = init_params(kw, in_features, num_heads, use_bias=True)

    # Pack ONCE (hoisted out of the per-step path), then run the kernel.
    w_pack, meta = pack_headwise_params(weight)
    out = jax.block_until_ready(linear_headwise_expand_packed(x, w_pack, meta, bias))
    out_nobias = jax.block_until_ready(linear_headwise_expand_packed(x, w_pack, meta, None))

    # Reference (fp32-faithful einsum). Kernel uses default MXU precision
    # (operands truncated to bf16), hence the moderate tolerance.
    x_r = x.reshape(B, S, num_heads, in_features // num_heads)
    ref = jnp.einsum("bshi,hoi->bsho", x_r, weight,
                     precision=jax.lax.Precision.HIGHEST).reshape(B, S, -1)
    assert out.shape == (B, S, in_features)
    assert jnp.allclose(out, ref + bias, atol=2e-2, rtol=2e-2)
    assert jnp.allclose(out_nobias, ref, atol=2e-2, rtol=2e-2)

    print("KERNEL_OK")
</pallas_src>

<mosaic_0001>
module attributes {stable_mosaic.version = 11 : i64} {
  func.func @_kernel_bias(%arg0: i32, %arg1: i32, %arg2: i32, %arg3: memref<16x32xf32, #tpu.memory_space<vmem>>, %arg4: memref<1x32x32xf32, #tpu.memory_space<vmem>>, %arg5: memref<1x1x32xf32, #tpu.memory_space<vmem>>, %arg6: memref<16x32xf32, #tpu.memory_space<vmem>>) attributes {dimension_semantics = [#tpu.dimension_semantics<parallel>, #tpu.dimension_semantics<parallel>, #tpu.dimension_semantics<parallel>], iteration_bounds = array<i64: 1, 1, 1>, scalar_prefetch = 0 : i64, scratch_operands = 0 : i64, tpu.core_type = #tpu.core_type<tc>, window_params = [{transform_indices = @transform_0, window_bounds = array<i64: 16, 32>}, {transform_indices = @transform_1, window_bounds = array<i64: 1, 32, 32>}, {transform_indices = @transform_2, window_bounds = array<i64: 1, 1, 32>}, {transform_indices = @transform_3, window_bounds = array<i64: 16, 32>}]} {
    %c0 = arith.constant 0 : index
    %c0_0 = arith.constant 0 : index
    %0 = vector.load %arg3[%c0, %c0_0] : memref<16x32xf32, #tpu.memory_space<vmem>>, vector<16x32xf32>
    %c0_1 = arith.constant 0 : index
    %c0_2 = arith.constant 0 : index
    %c0_3 = arith.constant 0 : index
    %1 = vector.load %arg4[%c0_1, %c0_2, %c0_3] : memref<1x32x32xf32, #tpu.memory_space<vmem>>, vector<1x32x32xf32>
    %2 = vector.shape_cast %1 : vector<1x32x32xf32> to vector<32x32xf32>
    %cst = arith.constant dense<0.000000e+00> : vector<16x32xf32>
    %3 = tpu.matmul %0, %2, %cst {dimension_numbers = #tpu.dot_dimension_numbers<[1], [0], [0], [1], [0, 0, 1, 1], [], []>} : vector<16x32xf32>, vector<32x32xf32>, vector<16x32xf32> -> vector<16x32xf32>
    %c0_4 = arith.constant 0 : index
    %c0_5 = arith.constant 0 : index
    %c0_6 = arith.constant 0 : index
    %4 = vector.load %arg5[%c0_4, %c0_5, %c0_6] : memref<1x1x32xf32, #tpu.memory_space<vmem>>, vector<1x1x32xf32>
    %5 = vector.shape_cast %4 : vector<1x1x32xf32> to vector<1x32xf32>
    %6 = vector.broadcast %5 : vector<1x32xf32> to vector<16x32xf32>
    %7 = arith.addf %3, %6 : vector<16x32xf32>
    %c0_7 = arith.constant 0 : index
    %c0_8 = arith.constant 0 : index
    %8 = vector.load %arg6[%c0_7, %c0_8] : memref<16x32xf32, #tpu.memory_space<vmem>>, vector<16x32xf32>
    tpu.vector_store %arg6[%c0_7, %c0_8], %7 {strides = array<i32>} : memref<16x32xf32, #tpu.memory_space<vmem>>, vector<16x32xf32>,
    return
  }
  func.func @transform_0(%arg0: i32, %arg1: i32, %arg2: i32) -> (i32, i32) {
    %c0_i32 = arith.constant 0 : i32
    return %arg2, %arg0 : i32, i32
  }
  func.func @transform_1(%arg0: i32, %arg1: i32, %arg2: i32) -> (i32, i32, i32) {
    %c0_i32 = arith.constant 0 : i32
    %c0_i32_0 = arith.constant 0 : i32
    return %arg0, %c0_i32, %arg1 : i32, i32, i32
  }
  func.func @transform_2(%arg0: i32, %arg1: i32, %arg2: i32) -> (i32, i32, i32) {
    %c1_i32 = arith.constant 1 : i32
    %0 = arith.muli %arg0, %c1_i32 : i32
    %1 = arith.addi %0, %arg1 : i32
    %c0_i32 = arith.constant 0 : i32
    %c0_i32_0 = arith.constant 0 : i32
    %c0_i32_1 = arith.constant 0 : i32
    return %1, %c0_i32, %c0_i32_0 : i32, i32, i32
  }
  func.func @transform_3(%arg0: i32, %arg1: i32, %arg2: i32) -> (i32, i32) {
    %c1_i32 = arith.constant 1 : i32
    %0 = arith.muli %arg0, %c1_i32 : i32
    %1 = arith.addi %0, %arg1 : i32
    %c0_i32 = arith.constant 0 : i32
    return %arg2, %1 : i32, i32
  }
}

</mosaic_0001>

<bundles_post_ra>
// kernel: tpu_custom_call.1
= control target key start
LH: loop header
LB: loop body
LE: loop exit
PB: predicated region body
PF: predicated region fallthrough
CT: control target
= control target key end

     0   :  { %8 = vsyncpa [#allocation3], 0  ;;  %s320_s0 = inlined_call_operand.hbm [shape: f32[16,32], index: 0, kind: input, shape index: {}]   ;;  %s321_s1 = inlined_call_operand.hbm [shape: f32[1,32,32], index: 1, kind: input, shape index: {}]   ;;  %s322_s2 = inlined_call_operand.vmem [shape: f32[1,1,32], index: 2, kind: input, shape index: {}]   ;;  %s323_s3 = inlined_call_operand.hbm [shape: f32[16,32], index: 3, kind: output, shape index: {}]  }
   0x1   :  { %9 = vsyncpa [#allocation6], 0 }
   0x2   :  { %10 = vsyncpa [#allocation4], 0  ;;  %s270_s12 = smov [#allocation2]  }
   0x3   :  { %s16_s13 = sshll.u32 %s270_s12, 4  ;;  %s17_s13 = int_to_ptr.vmem [resolvable:$true] %s16_s13 }
   0x4   :  { %s212_s14 = scalar_lea.vmem %s17_s13, 256  ;;  %p217_p1 = scmp.lt.s32.totalorder %s17_s13, %s17_s13 }
   0x5   :  { %p213_p0 = scmp.ne.s32.totalorder %s17_s13, %s212_s14  ;;  %p218_p2 = scmp.lt.s32.totalorder %s212_s14, %s212_s14 }
   0x7   :  { %p219_p3 = por %p218_p2, %p217_p1 }
   0x9   :  { %p220_p4 = pnand %p219_p3, %p213_p0 }
   0xb   :  { %223 = shalt.err (!%p220_p4)
}
   0xc   :  { %s271_s15 = smov 128   ;;  %s272_s16 = smov 8  }
   0xd   :  { %22 = dma.hbm_to_vmem [thread:$0]  %s320_s0, 256, %s17_s13, [#allocation3], %s271_s15, %s271_s15, %s272_s16  }
   0xe   :  { %s273_s19 = smov [#allocation5]  }
   0xf   :  { %s28_s20 = sshll.u32 %s273_s19, 4  ;;  %s29_s20 = int_to_ptr.vmem [resolvable:$true] %s28_s20 }
  0x10   :  { %s232_s21 = scalar_lea.vmem %s29_s20, 512  ;;  %p237_p6 = scmp.lt.s32.totalorder %s29_s20, %s29_s20 }
  0x11   :  { %p233_p5 = scmp.ne.s32.totalorder %s29_s20, %s232_s21  ;;  %p238_p7 = scmp.lt.s32.totalorder %s232_s21, %s232_s21 }
  0x13   :  { %p239_p8 = por %p238_p7, %p237_p6 }
  0x15   :  { %p240_p9 = pnand %p239_p8, %p233_p5 }
  0x17   :  { %243 = shalt.err (!%p240_p9)
}
  0x18   :  { %34 = dma.hbm_to_vmem [thread:$0]  %s321_s1, 512, %s29_s20, [#allocation6], %s271_s15, %s271_s15, %s272_s16  }
  0x19   :  { %264 = dma.done.wait [#allocation3], 256  }
  0x1a   :  { %265 = vsyncadd [#allocation3], 4294967040 }
  0x1b   :  { %266 = dma.done.wait [#allocation6], 512  }
  0x1c   :  { %267 = vsyncadd [#allocation6], 4294966784  ;;  %vm71_vm0 = vcmask 261120   ;;  %v63_v0 = vld [vmem:[#allocation5 + $0x18] sm:$0xff]  ;;  %v62_v1 = vld [vmem:[#allocation5 + $0x10] sm:$0xff]  ;;  %s274_s24 = smov [#allocation7]  }
  0x1d   :  { %188 = vmatprep.subr.mxu0 %v63_v0  ;;  %v58_v2 = vld [vmem:[#allocation2] sm:$0xff]  ;;  %v61_v3 = vld [vmem:[#allocation5 + $0x8] sm:$0xff]  ;;  %v60_v4 = vld [vmem:[#allocation5] sm:$0xff]  ;;  %s163_s25 = sshll.u32 %s274_s24, 4  ;;  %s164_s25 = int_to_ptr.vmem [resolvable:$true] %s163_s25 }
  0x1e   :  { %189 = vmatpush3.msra.mxu0 %v63_v0  ;;  %196 = vmatprep.mubr.msk.f32.mxu0 %vm71_vm0, %v58_v2  ;;  %v59_v5 = vld [vmem:[#allocation2 + $0x8] sm:$0xff]  ;;  %v179_v6 = vld [vmem:[%s322_s2] ss:$0 sm:$0xff]  ;;  %s244_s26 = scalar_lea.vmem %s164_s25, 256  ;;  %p249_p11 = scmp.lt.s32.totalorder %s164_s25, %s164_s25 }
  0x1f   :  { %190 = vmatprep.subr.mxu0 %v62_v1  ;;  %p245_p10 = scmp.ne.s32.totalorder %s164_s25, %s244_s26  ;;  %p250_p12 = scmp.lt.s32.totalorder %s244_s26, %s244_s26 }
  0x20   :  { %191 = vmatpush3.msra.mxu0 %v62_v1 }
  0x21   :  { %192 = vmatprep.subr.mxu0 %v61_v3  ;;  %p251_p13 = por %p250_p12, %p249_p11 }
  0x22   :  { %193 = vmatpush3.msra.mxu0 %v61_v3 }
  0x23   :  { %194 = vmatprep.subr.mxu0 %v60_v4  ;;  %p252_p0 = pnand %p251_p13, %p245_p10 }
  0x24   :  { %195 = vmatpush3.msra.mxu0 %v60_v4 }
  0x25   :  { %197 = vmatmul.mubr.msk.f32.vlgmr.msra.gmra.mxu0 %vm71_vm0, %v59_v5 }
  0xe5   :  { %v198_v7 = vpop.f32.mrf.mxu0 }
  0xe6   :  { %v150_v8 = vadd.f32 %v198_v7, %v179_v6 }
  0xe7   :  { %v144_v9 = vpop.f32.mrf.mxu0 }
  0xe8   :  { %154 = vst.msk [vmem:[#allocation7 + $0x8] sm:$0xff] %vm71_vm0, %v150_v8  ;;  %v145_v10 = vadd.f32 %v179_v6, %v144_v9 }
  0xea   :  { %153 = vst.msk [vmem:[#allocation7] sm:$0xff] %vm71_vm0, %v145_v10 }
  0xeb   :  { %255 = shalt.err (!%p252_p0)
}
  0xec   :  { %169 = dma.vmem_to_hbm [thread:$0]  %s164_s25, 256, %s323_s3, [#allocation4], %s271_s15, %s271_s15, %s272_s16  }
  0xed   :  { %268 = dma.done.wait [#allocation4], 256  }
  0xee   :  { %269 = vsyncadd [#allocation4], 4294967040 }
  0xef   :  { %173 = vsyncpa [#allocation3], 1 }
  0xf0   :  { %174 = vsyncpa [#allocation6], 1 }
  0xf1   :  { %175 = vsyncpa [#allocation4], 1 }

</bundles_post_ra>
